<compile_context>
chip_gen: v7x
topology: tpu7x:2x2x1
jax: 0.10.0
libtpu: 0.0.40
codegen_flags: <defaults>
</compile_context>

<pallas_src>
import functools

import jax
import jax.numpy as jnp
import numpy as np
from jax.experimental import pallas as pl
from jax.experimental.pallas import tpu as pltpu

_LANE = 128


def _round_up(x, m):
    return (x + m - 1) // m * m


def _sublanes(dtype):
    return max(8, 32 // jnp.dtype(dtype).itemsize)   # 8 for f32, 16 for bf16


def _pad2d(a, rows, cols):
    pr, pc = rows - a.shape[0], cols - a.shape[1]
    if pr == 0 and pc == 0:
        return a
    return jnp.pad(a, ((0, pr), (0, pc)))


def _sigmoid(z, approx):
    # exp and reciprocal both ride the EUP slot; the VPU only carries the
    # negate/min/add.  Clamping the exp argument keeps it finite so the
    # approx-reciprocal path never has to map inf -> 0.
    return pl.reciprocal(1.0 + jnp.exp(jnp.minimum(-z, 30.0)), approx=approx)


def mlp_kernel(x_ref, w1_ref, b1_ref, w2_ref, b2_ref, w3_ref, b3_ref,
               w4_ref, b4_ref, o_ref, *, approx_sigmoid):
    f32 = jnp.float32

    # x arrives in its HBM storage dtype (f32); cast to the weights' compute
    # dtype in-kernel (no wrapper-side conversion pass over activations).
    x = x_ref[...].astype(w1_ref.dtype)

    # Biases are read once per tile as (1, N) f32 rows; implicit row-broadcast.
    b1 = b1_ref[...]
    b2 = b2_ref[...]
    b3 = b3_ref[...]
    b4 = b4_ref[...]

    # Matmuls accumulate in f32 on the MXU; element-wise math stays in f32
    # (v5e's VPU/EUP have no bf16 path), MXU inputs use the storage dtype.
    z1 = jnp.dot(x, w1_ref[...], preferred_element_type=f32) + b1
    h1 = _sigmoid(z1, approx_sigmoid).astype(w2_ref.dtype)

    z2 = jnp.dot(h1, w2_ref[...], preferred_element_type=f32) + b2
    h2 = _sigmoid(z2, approx_sigmoid).astype(w3_ref.dtype)

    z3 = jnp.dot(h2, w3_ref[...], preferred_element_type=f32) + b3
    h3 = _sigmoid(z3, approx_sigmoid).astype(w4_ref.dtype)

    y = jnp.dot(h3, w4_ref[...], preferred_element_type=f32) + b4
    o_ref[...] = y.astype(o_ref.dtype)


def prepare_params(params, compute_dtype=jnp.float32):
    """One-time pad/cast of the weights (hoisted out of the hot path).

    Hidden widths are zero-padded up to 128-lane multiples.  Padded weight ROWS
    are zero, so the sigmoid(0)=0.5 activations living in padded hidden columns
    never reach real outputs.  The final layer's COLUMNS (and its bias and the
    kernel output) keep the true out_dim so HBM writeback is not inflated.
    """
    (w1, b1), (w2, b2), (w3, b3), (w4, b4) = (
        params["input_layer"], params["hidden_feature_1"],
        params["hidden_feature_2"], params["predict_layer"])
    in_dim = w1.shape[0]
    h1, h2, h3, out_dim = w1.shape[1], w2.shape[1], w3.shape[1], w4.shape[1]
    H1, H2, H3 = (_round_up(d, _LANE) for d in (h1, h2, h3))

    w1p = _pad2d(w1, in_dim, H1).astype(compute_dtype)
    w2p = _pad2d(w2, H1, H2).astype(compute_dtype)
    w3p = _pad2d(w3, H2, H3).astype(compute_dtype)
    w4p = _pad2d(w4, H3, out_dim).astype(compute_dtype)   # rows padded, cols NOT
    b1p = _pad2d(b1, 1, H1).astype(jnp.float32)
    b2p = _pad2d(b2, 1, H2).astype(jnp.float32)
    b3p = _pad2d(b3, 1, H3).astype(jnp.float32)
    b4p = b4.astype(jnp.float32)                           # (1, out_dim), unpadded
    return tuple(jax.device_put(a)
                 for a in (w1p, b1p, w2p, b2p, w3p, b3p, w4p, b4p))


def net_forward(x, prepared, *, block_b=2048, approx_sigmoid=True,
                out_dtype=None, min_grid_steps=4):
    """x: [B, input_size].  prepared: output of prepare_params()."""
    w1p, b1p, w2p, b2p, w3p, b3p, w4p, b4p = prepared
    B, in_dim = x.shape
    out_dim = w4p.shape[1]
    compute_dtype = w1p.dtype
    if out_dtype is None:
        # bf16 path writes bf16 (halves writeback); f32 path stays f32.
        out_dtype = compute_dtype

    # ---- Batch tiling: large tiles to amortize per-step overhead, but capped
    #      so the grid has >= min_grid_steps steps (>=2 per v7x TensorCore). ----
    sub = max(_sublanes(x.dtype), _sublanes(out_dtype))
    tb = max(sub, min(_round_up(block_b, sub),
                      _round_up(pl.cdiv(B, min_grid_steps), sub)))
    grid = (pl.cdiv(B, tb),)   # partial tail block handled by Pallas masking

    # ---- VMEM budget from the actual tile/weight sizes (+ headroom). ----
    x_tile_bytes = tb * in_dim * jnp.dtype(x.dtype).itemsize
    out_tile_bytes = tb * out_dim * jnp.dtype(out_dtype).itemsize
    weight_bytes = sum(int(a.size) * a.dtype.itemsize for a in prepared)
    max_hidden = max(w1p.shape[1], w2p.shape[1], w3p.shape[1], out_dim)
    interm_bytes = 6 * tb * max_hidden * 4          # f32 z/h intermediates
    vmem_bytes = int(2 * (x_tile_bytes + out_tile_bytes)   # double-buffered tiles
                     + 2 * weight_bytes                    # resident (2 bufs worst case)
                     + interm_bytes) + (2 << 20)
    vmem_bytes = max(8 << 20, min(vmem_bytes, 32 << 20))

    kernel = functools.partial(mlp_kernel, approx_sigmoid=approx_sigmoid)
    resident = lambda i: (0, 0)                # weights/biases stay VMEM-resident
    out = pl.pallas_call(
        kernel,
        out_shape=jax.ShapeDtypeStruct((B, out_dim), out_dtype),
        grid=grid,
        in_specs=[
            pl.BlockSpec((tb, in_dim), lambda i: (i, 0)),
            pl.BlockSpec(w1p.shape, resident), pl.BlockSpec(b1p.shape, resident),
            pl.BlockSpec(w2p.shape, resident), pl.BlockSpec(b2p.shape, resident),
            pl.BlockSpec(w3p.shape, resident), pl.BlockSpec(b3p.shape, resident),
            pl.BlockSpec(w4p.shape, resident), pl.BlockSpec(b4p.shape, resident),
        ],
        out_specs=pl.BlockSpec((tb, out_dim), lambda i: (i, 0)),
        compiler_params=pltpu.CompilerParams(
            dimension_semantics=("parallel",),   # lets v7x shard batch over 2 TCs
            vmem_limit_bytes=vmem_bytes),
    )(x, w1p, b1p, w2p, b2p, w3p, b3p, w4p, b4p)
    return out


def init_params(key, input_size, output_size):
    """Deterministic init mimicking torch.nn.Linear (uniform +/- 1/sqrt(fan_in))."""
    dims = [
        ("input_layer", input_size, 4 * input_size),
        ("hidden_feature_1", 4 * input_size, output_size),
        ("hidden_feature_2", output_size, output_size),
        ("predict_layer", output_size, output_size),
    ]
    params = {}
    for name, fan_in, fan_out in dims:
        key, kw, kb = jax.random.split(key, 3)
        bound = 1.0 / np.sqrt(fan_in)
        w = jax.random.uniform(kw, (fan_in, fan_out), jnp.float32, -bound, bound)
        b = jax.random.uniform(kb, (1, fan_out), jnp.float32, -bound, bound)
        params[name] = (w, b)
    return params


def reference_forward(x, params):
    (w1, b1), (w2, b2), (w3, b3), (w4, b4) = (
        params["input_layer"], params["hidden_feature_1"],
        params["hidden_feature_2"], params["predict_layer"])
    h = jax.nn.sigmoid(x @ w1 + b1)
    h = jax.nn.sigmoid(h @ w2 + b2)
    h = jax.nn.sigmoid(h @ w3 + b3)
    return h @ w4 + b4


if __name__ == "__main__":
    input_size, output_size = 16, 32   # ner_size is unused by the torch module

    key = jax.random.PRNGKey(0)
    key, kx = jax.random.split(key)
    params = init_params(key, input_size, output_size)

    # (1) Small batch, f32 path, exact reciprocal -> tight parity check.
    prep_f32 = prepare_params(params, compute_dtype=jnp.float32)
    x_small = jax.random.normal(kx, (8, input_size), jnp.float32)
    out_f32 = net_forward(x_small, prep_f32, approx_sigmoid=False)
    jax.block_until_ready(out_f32)
    ref_small = reference_forward(x_small, params)
    np.testing.assert_allclose(np.asarray(out_f32), np.asarray(ref_small),
                               rtol=1e-4, atol=1e-5)

    # (2) Larger, non-tile-multiple batch exercising the multi-step pipelined
    #     grid and the masked tail block, with the fast path: bf16 weights,
    #     f32 MXU accumulation, approx reciprocal, bf16 output writeback.
    prep_bf16 = prepare_params(params, compute_dtype=jnp.bfloat16)
    key, kx2 = jax.random.split(key)
    x_big = jax.random.normal(kx2, (1027, input_size), jnp.float32)
    out_bf16 = net_forward(x_big, prep_bf16, block_b=2048, approx_sigmoid=True)
    jax.block_until_ready(out_bf16)
    ref_big = reference_forward(x_big, params)
    np.testing.assert_allclose(np.asarray(out_bf16).astype(np.float32),
                               np.asarray(ref_big), rtol=5e-2, atol=5e-2)

    print("KERNEL_OK")
</pallas_src>

<mosaic_0001>
module attributes {stable_mosaic.version = 11 : i64} {
  func.func @mlp_kernel(%arg0: i32, %arg1: memref<8x16xf32, #tpu.memory_space<vmem>>, %arg2: memref<16x128xf32, #tpu.memory_space<vmem>>, %arg3: memref<1x128xf32, #tpu.memory_space<vmem>>, %arg4: memref<128x128xf32, #tpu.memory_space<vmem>>, %arg5: memref<1x128xf32, #tpu.memory_space<vmem>>, %arg6: memref<128x128xf32, #tpu.memory_space<vmem>>, %arg7: memref<1x128xf32, #tpu.memory_space<vmem>>, %arg8: memref<128x32xf32, #tpu.memory_space<vmem>>, %arg9: memref<1x32xf32, #tpu.memory_space<vmem>>, %arg10: memref<8x32xf32, #tpu.memory_space<vmem>>) attributes {dimension_semantics = [#tpu.dimension_semantics<parallel>], iteration_bounds = array<i64: 1>, scalar_prefetch = 0 : i64, scratch_operands = 0 : i64, tpu.core_type = #tpu.core_type<tc>, window_params = [{transform_indices = @transform_0, window_bounds = array<i64: 8, 16>}, {pipeline_mode = #tpu.pipeline_mode<synchronous>, transform_indices = @transform_1, window_bounds = array<i64: 16, 128>}, {pipeline_mode = #tpu.pipeline_mode<synchronous>, transform_indices = @transform_2, window_bounds = array<i64: 1, 128>}, {pipeline_mode = #tpu.pipeline_mode<synchronous>, transform_indices = @transform_3, window_bounds = array<i64: 128, 128>}, {pipeline_mode = #tpu.pipeline_mode<synchronous>, transform_indices = @transform_4, window_bounds = array<i64: 1, 128>}, {pipeline_mode = #tpu.pipeline_mode<synchronous>, transform_indices = @transform_5, window_bounds = array<i64: 128, 128>}, {pipeline_mode = #tpu.pipeline_mode<synchronous>, transform_indices = @transform_6, window_bounds = array<i64: 1, 128>}, {pipeline_mode = #tpu.pipeline_mode<synchronous>, transform_indices = @transform_7, window_bounds = array<i64: 128, 32>}, {pipeline_mode = #tpu.pipeline_mode<synchronous>, transform_indices = @transform_8, window_bounds = array<i64: 1, 32>}, {transform_indices = @transform_9, window_bounds = array<i64: 8, 32>}]} {
    %c0 = arith.constant 0 : index
    %c0_0 = arith.constant 0 : index
    %0 = vector.load %arg1[%c0, %c0_0] : memref<8x16xf32, #tpu.memory_space<vmem>>, vector<8x16xf32>
    %c0_1 = arith.constant 0 : index
    %c0_2 = arith.constant 0 : index
    %1 = vector.load %arg3[%c0_1, %c0_2] : memref<1x128xf32, #tpu.memory_space<vmem>>, vector<1x128xf32>
    %c0_3 = arith.constant 0 : index
    %c0_4 = arith.constant 0 : index
    %2 = vector.load %arg5[%c0_3, %c0_4] : memref<1x128xf32, #tpu.memory_space<vmem>>, vector<1x128xf32>
    %c0_5 = arith.constant 0 : index
    %c0_6 = arith.constant 0 : index
    %3 = vector.load %arg7[%c0_5, %c0_6] : memref<1x128xf32, #tpu.memory_space<vmem>>, vector<1x128xf32>
    %c0_7 = arith.constant 0 : index
    %c0_8 = arith.constant 0 : index
    %4 = vector.load %arg9[%c0_7, %c0_8] : memref<1x32xf32, #tpu.memory_space<vmem>>, vector<1x32xf32>
    %c0_9 = arith.constant 0 : index
    %c0_10 = arith.constant 0 : index
    %5 = vector.load %arg2[%c0_9, %c0_10] : memref<16x128xf32, #tpu.memory_space<vmem>>, vector<16x128xf32>
    %cst = arith.constant dense<0.000000e+00> : vector<8x128xf32>
    %6 = tpu.matmul %0, %5, %cst {dimension_numbers = #tpu.dot_dimension_numbers<[1], [0], [0], [1], [0, 0, 1, 1], [], []>} : vector<8x16xf32>, vector<16x128xf32>, vector<8x128xf32> -> vector<8x128xf32>
    %7 = vector.broadcast %1 : vector<1x128xf32> to vector<8x128xf32>
    %8 = arith.addf %6, %7 : vector<8x128xf32>
    %cst_11 = arith.constant 0.000000e+00 : f32
    %9 = vector.broadcast %cst_11 : f32 to vector<8x128xf32>
    %10 = arith.subf %9, %8 : vector<8x128xf32>
    %cst_12 = arith.constant 3.000000e+01 : f32
    %11 = vector.broadcast %cst_12 : f32 to vector<8x128xf32>
    %12 = arith.minimumf %10, %11 : vector<8x128xf32>
    %13 = math.exp %12 : vector<8x128xf32>
    %cst_13 = arith.constant 1.000000e+00 : f32
    %14 = vector.broadcast %cst_13 : f32 to vector<8x128xf32>
    %15 = arith.addf %14, %13 : vector<8x128xf32>
    %16 = tpu.reciprocal %15 : vector<8x128xf32> -> vector<8x128xf32>
    %c0_14 = arith.constant 0 : index
    %c0_15 = arith.constant 0 : index
    %17 = vector.load %arg4[%c0_14, %c0_15] : memref<128x128xf32, #tpu.memory_space<vmem>>, vector<128x128xf32>
    %cst_16 = arith.constant dense<0.000000e+00> : vector<8x128xf32>
    %18 = tpu.matmul %16, %17, %cst_16 {dimension_numbers = #tpu.dot_dimension_numbers<[1], [0], [0], [1], [0, 0, 1, 1], [], []>} : vector<8x128xf32>, vector<128x128xf32>, vector<8x128xf32> -> vector<8x128xf32>
    %19 = vector.broadcast %2 : vector<1x128xf32> to vector<8x128xf32>
    %20 = arith.addf %18, %19 : vector<8x128xf32>
    %cst_17 = arith.constant 0.000000e+00 : f32
    %21 = vector.broadcast %cst_17 : f32 to vector<8x128xf32>
    %22 = arith.subf %21, %20 : vector<8x128xf32>
    %cst_18 = arith.constant 3.000000e+01 : f32
    %23 = vector.broadcast %cst_18 : f32 to vector<8x128xf32>
    %24 = arith.minimumf %22, %23 : vector<8x128xf32>
    %25 = math.exp %24 : vector<8x128xf32>
    %cst_19 = arith.constant 1.000000e+00 : f32
    %26 = vector.broadcast %cst_19 : f32 to vector<8x128xf32>
    %27 = arith.addf %26, %25 : vector<8x128xf32>
    %28 = tpu.reciprocal %27 : vector<8x128xf32> -> vector<8x128xf32>
    %c0_20 = arith.constant 0 : index
    %c0_21 = arith.constant 0 : index
    %29 = vector.load %arg6[%c0_20, %c0_21] : memref<128x128xf32, #tpu.memory_space<vmem>>, vector<128x128xf32>
    %cst_22 = arith.constant dense<0.000000e+00> : vector<8x128xf32>
    %30 = tpu.matmul %28, %29, %cst_22 {dimension_numbers = #tpu.dot_dimension_numbers<[1], [0], [0], [1], [0, 0, 1, 1], [], []>} : vector<8x128xf32>, vector<128x128xf32>, vector<8x128xf32> -> vector<8x128xf32>
    %31 = vector.broadcast %3 : vector<1x128xf32> to vector<8x128xf32>
    %32 = arith.addf %30, %31 : vector<8x128xf32>
    %cst_23 = arith.constant 0.000000e+00 : f32
    %33 = vector.broadcast %cst_23 : f32 to vector<8x128xf32>
    %34 = arith.subf %33, %32 : vector<8x128xf32>
    %cst_24 = arith.constant 3.000000e+01 : f32
    %35 = vector.broadcast %cst_24 : f32 to vector<8x128xf32>
    %36 = arith.minimumf %34, %35 : vector<8x128xf32>
    %37 = math.exp %36 : vector<8x128xf32>
    %cst_25 = arith.constant 1.000000e+00 : f32
    %38 = vector.broadcast %cst_25 : f32 to vector<8x128xf32>
    %39 = arith.addf %38, %37 : vector<8x128xf32>
    %40 = tpu.reciprocal %39 : vector<8x128xf32> -> vector<8x128xf32>
    %c0_26 = arith.constant 0 : index
    %c0_27 = arith.constant 0 : index
    %41 = vector.load %arg8[%c0_26, %c0_27] : memref<128x32xf32, #tpu.memory_space<vmem>>, vector<128x32xf32>
    %cst_28 = arith.constant dense<0.000000e+00> : vector<8x32xf32>
    %42 = tpu.matmul %40, %41, %cst_28 {dimension_numbers = #tpu.dot_dimension_numbers<[1], [0], [0], [1], [0, 0, 1, 1], [], []>} : vector<8x128xf32>, vector<128x32xf32>, vector<8x32xf32> -> vector<8x32xf32>
    %43 = vector.broadcast %4 : vector<1x32xf32> to vector<8x32xf32>
    %44 = arith.addf %42, %43 : vector<8x32xf32>
    %c0_29 = arith.constant 0 : index
    %c0_30 = arith.constant 0 : index
    %45 = vector.load %arg10[%c0_29, %c0_30] : memref<8x32xf32, #tpu.memory_space<vmem>>, vector<8x32xf32>
    tpu.vector_store %arg10[%c0_29, %c0_30], %44 {strides = array<i32>} : memref<8x32xf32, #tpu.memory_space<vmem>>, vector<8x32xf32>,
    return
  }
  func.func @transform_0(%arg0: i32) -> (i32, i32) {
    %c0_i32 = arith.constant 0 : i32
    %c0_i32_0 = arith.constant 0 : i32
    return %arg0, %c0_i32 : i32, i32
  }
  func.func @transform_1(%arg0: i32) -> (i32, i32) {
    %c0_i32 = arith.constant 0 : i32
    %c0_i32_0 = arith.constant 0 : i32
    %c0_i32_1 = arith.constant 0 : i32
    return %c0_i32, %c0_i32_0 : i32, i32
  }
  func.func @transform_2(%arg0: i32) -> (i32, i32) {
    %c0_i32 = arith.constant 0 : i32
    %c0_i32_0 = arith.constant 0 : i32
    %c0_i32_1 = arith.constant 0 : i32
    return %c0_i32, %c0_i32_0 : i32, i32
  }
  func.func @transform_3(%arg0: i32) -> (i32, i32) {
    %c0_i32 = arith.constant 0 : i32
    %c0_i32_0 = arith.constant 0 : i32
    %c0_i32_1 = arith.constant 0 : i32
    return %c0_i32, %c0_i32_0 : i32, i32
  }
  func.func @transform_4(%arg0: i32) -> (i32, i32) {
    %c0_i32 = arith.constant 0 : i32
    %c0_i32_0 = arith.constant 0 : i32
    %c0_i32_1 = arith.constant 0 : i32
    return %c0_i32, %c0_i32_0 : i32, i32
  }
  func.func @transform_5(%arg0: i32) -> (i32, i32) {
    %c0_i32 = arith.constant 0 : i32
    %c0_i32_0 = arith.constant 0 : i32
    %c0_i32_1 = arith.constant 0 : i32
    return %c0_i32, %c0_i32_0 : i32, i32
  }
  func.func @transform_6(%arg0: i32) -> (i32, i32) {
    %c0_i32 = arith.constant 0 : i32
    %c0_i32_0 = arith.constant 0 : i32
    %c0_i32_1 = arith.constant 0 : i32
    return %c0_i32, %c0_i32_0 : i32, i32
  }
  func.func @transform_7(%arg0: i32) -> (i32, i32) {
    %c0_i32 = arith.constant 0 : i32
    %c0_i32_0 = arith.constant 0 : i32
    %c0_i32_1 = arith.constant 0 : i32
    return %c0_i32, %c0_i32_0 : i32, i32
  }
  func.func @transform_8(%arg0: i32) -> (i32, i32) {
    %c0_i32 = arith.constant 0 : i32
    %c0_i32_0 = arith.constant 0 : i32
    %c0_i32_1 = arith.constant 0 : i32
    return %c0_i32, %c0_i32_0 : i32, i32
  }
  func.func @transform_9(%arg0: i32) -> (i32, i32) {
    %c0_i32 = arith.constant 0 : i32
    %c0_i32_0 = arith.constant 0 : i32
    return %arg0, %c0_i32 : i32, i32
  }
}

</mosaic_0001>

<bundles_post_ra>
// kernel: tpu_custom_call.1
= control target key start
LH: loop header
LB: loop body
LE: loop exit
PB: predicated region body
PF: predicated region fallthrough
CT: control target
= control target key end

     0   :  { %14 = vsyncpa [#allocation3], 0  ;;  %s989_s0 = inlined_call_operand.vmem [shape: f32[8,16], index: 0, kind: input, shape index: {}]   ;;  %s990_s1 = inlined_call_operand.vmem [shape: f32[16,128], index: 1, kind: input, shape index: {}]   ;;  %s991_s2 = inlined_call_operand.vmem [shape: f32[1,128], index: 2, kind: input, shape index: {}]   ;;  %s992_s3 = inlined_call_operand.vmem [shape: f32[128,128], index: 3, kind: input, shape index: {}]   ;;  %s993_s4 = inlined_call_operand.vmem [shape: f32[1,128], index: 4, kind: input, shape index: {}]   ;;  %s994_s5 = inlined_call_operand.hbm [shape: f32[128,128], index: 5, kind: input, shape index: {}]   ;;  %s995_s6 = inlined_call_operand.vmem [shape: f32[1,128], index: 6, kind: input, shape index: {}]   ;;  %s996_s7 = inlined_call_operand.vmem [shape: f32[128,32], index: 7, kind: input, shape index: {}]   ;;  %s997_s8 = inlined_call_operand.vmem [shape: f32[1,32], index: 8, kind: input, shape index: {}]   ;;  %s998_s9 = inlined_call_operand.hbm [shape: f32[8,32], index: 9, kind: output, shape index: {}]  }
   0x1   :  { %15 = vsyncpa [#allocation4], 0  ;;  %s758_s30 = smov [#allocation2]   ;;  %s710_s13 = scalar_lea.hbm %s994_s5, 2048 }
   0x2   :  { %s31_s10 = sshll.u32 %s758_s30, 4  ;;  %p711_p0 = scmp.ne.s32.totalorder %s994_s5, %s710_s13  ;;  %s32_s10 = int_to_ptr.vmem [resolvable:$true] %s31_s10 }
   0x3   :  { %p714_p1 = scmp.lt.u32.totalorder %s710_s13, %s994_s5 }
   0x5   :  { %p716_p2 = pnand %p714_p1, %p711_p0 }
   0x7   :  { %719 = shalt.err (!%p716_p2)
}
   0x8   :  { %s720_s18 = scalar_lea.vmem %s32_s10, 2048  ;;  %p725_p4 = scmp.lt.s32.totalorder %s32_s10, %s32_s10 }
   0x9   :  { %p721_p3 = scmp.ne.s32.totalorder %s32_s10, %s720_s18  ;;  %p726_p5 = scmp.lt.s32.totalorder %s720_s18, %s720_s18 }
   0xb   :  { %p727_p6 = por %p726_p5, %p725_p4 }
   0xd   :  { %p728_p7 = pnand %p727_p6, %p721_p3 }
   0xf   :  { %731 = shalt.err (!%p728_p7)
}
  0x10   :  { %s759_s19 = smov 128   ;;  %s760_s20 = smov 8  }
  0x11   :  { %37 = dma.hbm_to_vmem [thread:$0]  %s994_s5, 2048, %s32_s10, [#allocation3], %s759_s19, %s759_s19, %s760_s20  }
  0x12   :  { %754 = dma.done.wait [#allocation3], 2048  }
  0x13   :  { %755 = vsyncadd [#allocation3], 4294965248  ;;  %v761_v0 = vmov 0.0|0.0   ;;  %vm762_vm0 = vmmov 0   ;;  %v763_v1 = vmov 0.0   ;;  %v52_v2 = vld [vmem:[%s990_s1] sm:$0xff] }
  0x14   :  { %616 = vmatprep.subr.bf16.mxu0 %v761_v0  ;;  %508 = vmatprep.mubr.msk.f32.mxu0 %vm762_vm0, %v763_v1  ;;  %v53_v3 = vld [vmem:[%s990_s1 + $0x8] sm:$0xff]  ;;  %v47_v5 = vld [vmem:[%s989_s0] sm:$0xff]  ;;  %vm60_vm1 = vcmask 130048   ;;  %v142_v9 = vld [vmem:[%s992_s3 + $0x10] sm:$0xff]  ;;  %s764_s22 = smov [#allocation5]   ;;  %vm428_vm2 = vcmask 261120  }
  0x15   :  { %619 = vmatprep.subr.bf16.mxu1 %v761_v0  ;;  %543 = vmatprep.mubr.msk.f32.mxu1 %vm762_vm0, %v763_v1  ;;  %v617_v4 = vpack.c.bf16 %v53_v3, %v52_v2  ;;  %v140_v6 = vld [vmem:[%s992_s3] sm:$0xff]  ;;  %v141_v7 = vld [vmem:[%s992_s3 + $0x8] sm:$0xff]  ;;  %v143_v10 = vld [vmem:[%s992_s3 + $0x18] sm:$0xff]  ;;  %s436_s23 = sshll.u32 %s764_s22, 4  ;;  %s437_s23 = int_to_ptr.vmem [resolvable:$true] %s436_s23 }
  0x16   :  { %v620_v8 = vpack.c.bf16 %v141_v7, %v140_v6  ;;  %v623_v11 = vpack.c.bf16 %v143_v10, %v142_v9  ;;  %v144_v12 = vld [vmem:[%s992_s3 + $0x20] sm:$0xff]  ;;  %v145_v13 = vld [vmem:[%s992_s3 + $0x28] sm:$0xff]  ;;  %v146_v15 = vld [vmem:[%s992_s3 + $0x30] sm:$0xff]  ;;  %p737_p9 = scmp.lt.s32.totalorder %s437_s23, %s437_s23 }
  0x17   :  { %618 = vmatpush3.bf16.msra.mxu0 %v617_v4  ;;  %v626_v14 = vpack.c.bf16 %v145_v13, %v144_v12  ;;  %v147_v16 = vld [vmem:[%s992_s3 + $0x38] sm:$0xff]  ;;  %v148_v18 = vld [vmem:[%s992_s3 + $0x40] sm:$0xff]  ;;  %v149_v19 = vld [vmem:[%s992_s3 + $0x48] sm:$0xff] }
  0x18   :  { %643 = vmatprep.subr.bf16.mxu0 %v761_v0  ;;  %621 = vmatpush3.bf16.msra.mxu1 %v620_v8  ;;  %v629_v17 = vpack.c.bf16 %v147_v16, %v146_v15  ;;  %v632_v20 = vpack.c.bf16 %v149_v19, %v148_v18  ;;  %v150_v21 = vld [vmem:[%s992_s3 + $0x50] sm:$0xff]  ;;  %v151_v22 = vld [vmem:[%s992_s3 + $0x58] sm:$0xff]  ;;  %v152_v24 = vld [vmem:[%s992_s3 + $0x60] sm:$0xff] }
  0x19   :  { %622 = vmatprep.subr.bf16.mxu1 %v761_v0  ;;  %v635_v23 = vpack.c.bf16 %v151_v22, %v150_v21  ;;  %v153_v25 = vld [vmem:[%s992_s3 + $0x68] sm:$0xff]  ;;  %v154_v27 = vld [vmem:[%s992_s3 + $0x70] sm:$0xff]  ;;  %v155_v28 = vld [vmem:[%s992_s3 + $0x78] sm:$0xff] }
  0x1a   :  { %509 = vmatmul.mubr.msk.f32.vlgmr.msra.gmra.mrb[0].mxu0 %vm60_vm1, %v47_v5  ;;  %v638_v26 = vpack.c.bf16 %v153_v25, %v152_v24  ;;  %v641_v29 = vpack.c.bf16 %v155_v28, %v154_v27  ;;  %v445_v30 = vld [vmem:[%s991_s2] ss:$0 sm:$0xff]  ;;  %v239_v41 = vld [vmem:[#allocation2 + $0x8] sm:$0xff]  ;;  %v240_v43 = vld [vmem:[#allocation2 + $0x10] sm:$0xff] }
  0x1b   :  { %578 = vmatprep.mubr.msk.f32.mxu0 %vm762_vm0, %v763_v1  ;;  %v238_v40 = vld [vmem:[#allocation2] sm:$0xff]  ;;  %v241_v44 = vld [vmem:[#allocation2 + $0x18] sm:$0xff]  ;;  %v243_v47 = vld [vmem:[#allocation2 + $0x28] sm:$0xff] }
  0x1c   :  { %624 = vmatpush3.bf16.msra.mxu1 %v623_v11  ;;  %v644_v42 = vpack.c.bf16 %v239_v41, %v238_v40  ;;  %v647_v45 = vpack.c.bf16 %v241_v44, %v240_v43  ;;  %v242_v46 = vld [vmem:[#allocation2 + $0x20] sm:$0xff]  ;;  %v244_v49 = vld [vmem:[#allocation2 + $0x30] sm:$0xff]  ;;  %v245_v50 = vld [vmem:[#allocation2 + $0x38] sm:$0xff] }
  0x1d   :  { %625 = vmatprep.subr.bf16.mxu1 %v761_v0  ;;  %v650_v48 = vpack.c.bf16 %v243_v47, %v242_v46  ;;  %v653_v51 = vpack.c.bf16 %v245_v50, %v244_v49  ;;  %v246_v52 = vld [vmem:[#allocation2 + $0x40] sm:$0xff]  ;;  %v247_v53 = vld [vmem:[#allocation2 + $0x48] sm:$0xff]  ;;  %v248_v55 = vld [vmem:[#allocation2 + $0x50] sm:$0xff] }
  0x1e   :  { %645 = vmatpush3.bf16.msra.mxu0 %v644_v42  ;;  %v656_v54 = vpack.c.bf16 %v247_v53, %v246_v52  ;;  %v249_v56 = vld [vmem:[#allocation2 + $0x58] sm:$0xff]  ;;  %v250_v58 = vld [vmem:[#allocation2 + $0x60] sm:$0xff]  ;;  %v251_v59 = vld [vmem:[#allocation2 + $0x68] sm:$0xff] }
  0x1f   :  { %646 = vmatprep.subr.bf16.mxu0 %v761_v0  ;;  %v659_v57 = vpack.c.bf16 %v249_v56, %v248_v55  ;;  %v662_v60 = vpack.c.bf16 %v251_v59, %v250_v58  ;;  %v252_v61 = vld [vmem:[#allocation2 + $0x70] sm:$0xff]  ;;  %v253_v62 = vld [vmem:[#allocation2 + $0x78] sm:$0xff]  ;;  %v336_v11 = vld [vmem:[%s996_s7] sm:$0xff] }
  0x20   :  { %627 = vmatpush3.bf16.msra.mxu1 %v626_v14  ;;  %v665_v63 = vpack.c.bf16 %v253_v62, %v252_v61  ;;  %v337_v12 = vld [vmem:[%s996_s7 + $0x8] sm:$0xff]  ;;  %v338_v14 = vld [vmem:[%s996_s7 + $0x10] sm:$0xff]  ;;  %v339_v15 = vld [vmem:[%s996_s7 + $0x18] sm:$0xff] }
  0x21   :  { %628 = vmatprep.subr.bf16.mxu1 %v761_v0  ;;  %v668_v13 = vpack.c.bf16 %v337_v12, %v336_v11  ;;  %v671_v16 = vpack.c.bf16 %v339_v15, %v338_v14  ;;  %v341_v18 = vld [vmem:[%s996_s7 + $0x28] sm:$0xff]  ;;  %v343_v21 = vld [vmem:[%s996_s7 + $0x38] sm:$0xff] }
  0x22   :  { %648 = vmatpush3.bf16.msra.mxu0 %v647_v45  ;;  %v345_v24 = vld [vmem:[%s996_s7 + $0x48] sm:$0xff]  ;;  %v347_v27 = vld [vmem:[%s996_s7 + $0x58] sm:$0xff] }
  0x23   :  { %649 = vmatprep.subr.bf16.mxu0 %v761_v0 }
  0x24   :  { %630 = vmatpush3.bf16.msra.mxu1 %v629_v17  ;;  %v340_v17 = vld [vmem:[%s996_s7 + $0x20] sm:$0xff] }
  0x25   :  { %631 = vmatprep.subr.bf16.mxu1 %v761_v0  ;;  %v674_v19 = vpack.c.bf16 %v341_v18, %v340_v17 }
  0x26   :  { %651 = vmatpush3.bf16.msra.mxu0 %v650_v48 }
  0x27   :  { %652 = vmatprep.subr.bf16.mxu0 %v761_v0 }
  0x28   :  { %633 = vmatpush3.bf16.msra.mxu1 %v632_v20  ;;  %v342_v20 = vld [vmem:[%s996_s7 + $0x30] sm:$0xff] }
  0x29   :  { %634 = vmatprep.subr.bf16.mxu1 %v761_v0  ;;  %v677_v22 = vpack.c.bf16 %v343_v21, %v342_v20 }
  0x2a   :  { %654 = vmatpush3.bf16.msra.mxu0 %v653_v51 }
  0x2b   :  { %655 = vmatprep.subr.bf16.mxu0 %v761_v0 }
  0x2c   :  { %636 = vmatpush3.bf16.msra.mxu1 %v635_v23  ;;  %v344_v23 = vld [vmem:[%s996_s7 + $0x40] sm:$0xff] }
  0x2d   :  { %637 = vmatprep.subr.bf16.mxu1 %v761_v0  ;;  %v680_v25 = vpack.c.bf16 %v345_v24, %v344_v23 }
  0x2e   :  { %657 = vmatpush3.bf16.msra.mxu0 %v656_v54 }
  0x2f   :  { %658 = vmatprep.subr.bf16.mxu0 %v761_v0 }
  0x30   :  { %639 = vmatpush3.bf16.msra.mxu1 %v638_v26  ;;  %v346_v26 = vld [vmem:[%s996_s7 + $0x50] sm:$0xff] }
  0x31   :  { %640 = vmatprep.subr.bf16.mxu1 %v761_v0  ;;  %v683_v28 = vpack.c.bf16 %v347_v27, %v346_v26 }
  0x32   :  { %660 = vmatpush3.bf16.msra.mxu0 %v659_v57 }
  0x33   :  { %661 = vmatprep.subr.bf16.mxu0 %v761_v0 }
  0x34   :  { %642 = vmatpush3.bf16.msra.mxu1 %v641_v29  ;;  %v348_v29 = vld [vmem:[%s996_s7 + $0x60] sm:$0xff] }
  0x35   :  { %667 = vmatprep.subr.bf16.mxu1 %v761_v0 }
  0x36   :  { %663 = vmatpush3.bf16.msra.mxu0 %v662_v60 }
  0x37   :  { %664 = vmatprep.subr.bf16.mxu0 %v761_v0 }
  0x3a   :  { %666 = vmatpush3.bf16.msra.mxu0 %v665_v63 }
  0xed   :  { %v130_v31 = vpop.f32.mrb[0].mxu0 }
  0xee   :  { %v131_v32 = vadd.f32 %v445_v30, %v130_v31  ;;  %v510_v33 = vpop.f32.mrb[1].mxu0  ;;  %v349_v30 = vld [vmem:[%s996_s7 + $0x68] sm:$0xff] }
  0xef   :  { %v686_v31 = vpack.c.bf16 %v349_v30, %v348_v29  ;;  %v351_v33 = vld [vmem:[%s996_s7 + $0x78] sm:$0xff] }
  0xf0   :  { %v134_v34 = vsub.f32 0.0, %v131_v32  ;;  %v350_v32 = vld [vmem:[%s996_s7 + $0x70] sm:$0xff] }
  0xf2   :  { %v135_v35 = vmin.f32 %v134_v34, 30.0  ;;  %v689_v34 = vpack.c.bf16 %v351_v33, %v350_v32 }
  0xf4   :  { %v136_v36 = vmul.f32 1.442695, %v135_v35  ;;  %v448_v35 = vld [vmem:[%s995_s6] ss:$0 sm:$0xff]  ;;  %s732_s6 = scalar_lea.vmem %s437_s23, 128 }
  0xf5   :  { %p733_p8 = scmp.ne.s32.totalorder %s437_s23, %s732_s6  ;;  %p738_p10 = scmp.lt.s32.totalorder %s732_s6, %s732_s6 }
  0xf6   :  { %698 = vpow2.f32 %v136_v36 }
  0xf7   :  { %p739_p11 = por %p738_p10, %p737_p9 }
  0xf9   :  { %p740_p12 = pnand %p739_p11, %p733_p8 }
 0x100   :  { %v699_v37 = vpop.eup %698 }
 0x101   :  { %v138_v38 = vadd.f32 1.0, %v699_v37 }
 0x103   :  { %700 = vrcp.f32 %v138_v38 }
 0x10d   :  { %v701_v39 = vpop.eup %700 }
 0x10e   :  { %544 = vmatmul.mubr.f32.vlgmr.msra.gmra.mrb[0].mxu1 %v701_v39 }
 0x10f   :  { %613 = vmatprep.mubr.msk.f32.mxu1 %vm762_vm0, %v763_v1  ;;  %v447_v1 = vld [vmem:[%s993_s4] ss:$0 sm:$0xff]  ;;  %669 = vmatpush3.bf16.msra.mxu1 %v668_v13 }
 0x110   :  { %670 = vmatprep.subr.bf16.mxu1 %v761_v0 }
 0x113   :  { %672 = vmatpush3.bf16.msra.mxu1 %v671_v16 }
 0x114   :  { %673 = vmatprep.subr.bf16.mxu1 %v761_v0 }
 0x117   :  { %675 = vmatpush3.bf16.msra.mxu1 %v674_v19 }
 0x118   :  { %676 = vmatprep.subr.bf16.mxu1 %v761_v0 }
 0x11b   :  { %678 = vmatpush3.bf16.msra.mxu1 %v677_v22 }
 0x11c   :  { %679 = vmatprep.subr.bf16.mxu1 %v761_v0 }
 0x11f   :  { %681 = vmatpush3.bf16.msra.mxu1 %v680_v25 }
 0x120   :  { %682 = vmatprep.subr.bf16.mxu1 %v761_v0 }
 0x123   :  { %684 = vmatpush3.bf16.msra.mxu1 %v683_v28 }
 0x124   :  { %685 = vmatprep.subr.bf16.mxu1 %v761_v0 }
 0x127   :  { %687 = vmatpush3.bf16.msra.mxu1 %v686_v31 }
 0x128   :  { %688 = vmatprep.subr.bf16.mxu1 %v761_v0  ;;  %v449_v0 = vld [vmem:[%s997_s8] ss:$0 sm:$0xff] }
 0x12b   :  { %690 = vmatpush3.bf16.msra.mxu1 %v689_v34 }
 0x1e1   :  { %v228_v2 = vpop.f32.mrb[0].mxu1 }
 0x1e2   :  { %v229_v3 = vadd.f32 %v447_v1, %v228_v2  ;;  %v545_v4 = vpop.f32.mrb[1].mxu1 }
 0x1e4   :  { %v232_v5 = vsub.f32 0.0, %v229_v3 }
 0x1e6   :  { %v233_v6 = vmin.f32 %v232_v5, 30.0 }
 0x1e8   :  { %v234_v7 = vmul.f32 1.442695, %v233_v6 }
 0x1ea   :  { %702 = vpow2.f32 %v234_v7 }
 0x1f4   :  { %v703_v8 = vpop.eup %702 }
 0x1f5   :  { %v236_v9 = vadd.f32 1.0, %v703_v8 }
 0x1f7   :  { %704 = vrcp.f32 %v236_v9 }
 0x201   :  { %v705_v10 = vpop.eup %704 }
 0x202   :  { %579 = vmatmul.mubr.f32.vlgmr.msra.gmra.mrb[2].mxu0 %v705_v10 }
 0x2d5   :  { %v326_v36 = vpop.f32.mrb[2].mxu0 }
 0x2d6   :  { %v327_v37 = vadd.f32 %v448_v35, %v326_v36  ;;  %v580_v38 = vpop.f32.mrb[3].mxu0 }
 0x2d8   :  { %v330_v39 = vsub.f32 0.0, %v327_v37 }
 0x2da   :  { %v331_v40 = vmin.f32 %v330_v39, 30.0 }
 0x2dc   :  { %v332_v41 = vmul.f32 1.442695, %v331_v40 }
 0x2de   :  { %706 = vpow2.f32 %v332_v41 }
 0x2e8   :  { %v707_v42 = vpop.eup %706 }
 0x2e9   :  { %v334_v43 = vadd.f32 1.0, %v707_v42 }
 0x2eb   :  { %708 = vrcp.f32 %v334_v43 }
 0x2f5   :  { %v709_v44 = vpop.eup %708 }
 0x2f6   :  { %614 = vmatmul.mubr.f32.vlgmr.msra.gmra.mrb[2].mxu1 %v709_v44 }
 0x3c9   :  { %v424_v45 = vpop.f32.mrb[2].mxu1 }
 0x3ca   :  { %v425_v46 = vadd.f32 %v449_v0, %v424_v45  ;;  %v615_v47 = vpop.f32.mrb[3].mxu1 }
 0x3cc   :  { %429 = vst.msk [vmem:[#allocation5] sm:$0xff] %vm428_vm2, %v425_v46 }
 0x3cd   :  { %743 = shalt.err (!%p740_p12)
}
 0x3ce   :  { %s744_s25 = scalar_lea.hbm %s998_s9, 128 }
 0x3cf   :  { %p745_p13 = scmp.ne.s32.totalorder %s998_s9, %s744_s25  ;;  %p748_p0 = scmp.lt.u32.totalorder %s744_s25, %s998_s9 }
 0x3d1   :  { %p750_p1 = pnand %p748_p0, %p745_p13 }
 0x3d3   :  { %753 = shalt.err (!%p750_p1)
}
 0x3d4   :  { %439 = dma.vmem_to_hbm [thread:$0]  %s437_s23, 128, %s998_s9, [#allocation4]  }
 0x3d5   :  { %756 = dma.done.wait [#allocation4], 128  }
 0x3d6   :  { %757 = vsyncadd [#allocation4], 4294967168 }
 0x3d7   :  { %443 = vsyncpa [#allocation3], 1 }
 0x3d8   :  { %444 = vsyncpa [#allocation4], 1 }

</bundles_post_ra>
